<compile_context>
chip_gen: v6e
topology: v6e:2x2x1
jax: 0.10.0
libtpu: 0.0.40
codegen_flags: <defaults>
</compile_context>

<pallas_src>
import math

import jax
import jax.numpy as jnp
import numpy as np
from jax.experimental import pallas as pl
from jax.experimental.pallas import tpu as pltpu


def _ntuple(n):
    import collections
    from itertools import repeat

    def parse(x):
        if isinstance(x, collections.abc.Iterable):
            return tuple(x)
        return tuple(repeat(x, n))

    return parse


_pair = _ntuple(2)


def _adaptive_windows(in_dim, out_dim):
    """Same window convention as the PyTorch reference."""
    return [
        (math.floor(i * in_dim / out_dim), math.ceil((i + 1) * in_dim / out_dim))
        for i in range(out_dim)
    ]


def _pool_matrix(in_dim, out_dim, dtype=np.float32):
    """P of shape (out_dim, in_dim) with P[i, k] = 1/window_len if k in window i."""
    P = np.zeros((out_dim, in_dim), dtype=dtype)
    for i, (lo, hi) in enumerate(_adaptive_windows(in_dim, out_dim)):
        P[i, lo:hi] = 1.0 / (hi - lo)
    return P


def _adaptive_avg_pool_kernel(x_ref, ph_ref, pw_ref, o_ref):
    # x_ref:  (TB, iH, iW)  tile of folded batch*channel images (native dtype)
    # ph_ref: (oH, iH)      row-pooling matrix, f32
    # pw_ref: (iW, oW)      col-pooling matrix, f32
    # o_ref:  (TB, oH, oW)
    x = x_ref[...]
    # Stage 1: contract h for the WHOLE bc-tile in one dot_general. Emitting
    # the natural dot_general order 'obw' avoids a relayout of the (larger)
    # intermediate; only the small final result gets transposed.
    tmp = jnp.einsum(
        "oh,bhw->obw", ph_ref[...], x, preferred_element_type=jnp.float32
    )  # (oH, TB, iW) f32
    # Stage 2: contract w; single dot_general, then a small (oH,TB,oW)->(TB,oH,oW)
    # permute on the tiny output.
    out = jnp.einsum(
        "obw,wq->boq", tmp, pw_ref[...], preferred_element_type=jnp.float32
    )  # (TB, oH, oW) f32
    o_ref[...] = out.astype(o_ref.dtype)


def _pick_block_bc(BC, iH, iW, oH, oW, x_itemsize, budget_bytes):
    """Largest BC tile whose pipeline footprint fits the VMEM budget."""
    per_row = (
        2 * iH * iW * x_itemsize  # double-buffered input tile
        + oH * iW * 4             # live f32 intermediate of stage 1
        + 2 * oH * oW * 4         # double-buffered output tile (f32 upper bound)
    )
    tb = max(1, budget_bytes // per_row)
    if BC > 8:
        # Keep at least 2 grid steps so v7x's two TensorCores both get work.
        tb = min(tb, -(-BC // 2))
    tb = min(tb, BC)
    if tb >= 8:
        tb = (tb // 8) * 8  # sublane-friendly leading dim
    return int(tb)


def adaptive_avg_pool2d(x, output_size):
    """x: (B, C, iH, iW) -> (B, C, oH, oW), preserving x.dtype."""
    oH, oW = _pair(output_size)
    B, C, iH, iW = x.shape
    BC = B * C

    pool_h = jnp.asarray(_pool_matrix(iH, oH))        # (oH, iH) f32
    pool_w = jnp.asarray(_pool_matrix(iW, oW).T)      # (iW, oW) f32

    # Keep x in its native dtype: no extra HBM read+write for an upcast pass,
    # and bf16 inputs move half the bytes of f32 on this memory-bound kernel.
    x_flat = x.reshape(BC, iH, iW)

    # ~36 MiB of pipeline buffers: safe on v5e/v6e (128 MiB physical VMEM) and
    # on v7x (64 MiB physical); scoped limit raised below to make room.
    vmem_budget = 36 * 1024 * 1024
    tb = _pick_block_bc(BC, iH, iW, oH, oW, x_flat.dtype.itemsize, vmem_budget)
    n_blocks = pl.cdiv(BC, tb)

    # TODO(synk): if the producer already emits NHWC with C >= 128, a lane-dense
    # 'oh,bhwc->bowc' path would use full vregs; not added here to avoid a
    # standalone HBM transpose.
    out_flat = pl.pallas_call(
        _adaptive_avg_pool_kernel,
        out_shape=jax.ShapeDtypeStruct((BC, oH, oW), x.dtype),
        grid_spec=pltpu.PrefetchScalarGridSpec(
            num_scalar_prefetch=0,
            grid=(n_blocks,),
            in_specs=[
                pl.BlockSpec((tb, iH, iW), lambda i: (i, 0, 0)),
                pl.BlockSpec((oH, iH), lambda i: (0, 0)),
                pl.BlockSpec((iW, oW), lambda i: (0, 0)),
            ],
            out_specs=pl.BlockSpec((tb, oH, oW), lambda i: (i, 0, 0)),
        ),
        compiler_params=pltpu.CompilerParams(
            dimension_semantics=("parallel",),
            vmem_limit_bytes=48 * 1024 * 1024,
        ),
    )(x_flat, pool_h, pool_w)

    return out_flat.reshape(B, C, oH, oW)


def _reference(x, output_size):
    """Pure numpy replica of the PyTorch forward, for verification."""
    oH, oW = _pair(output_size)
    x = np.asarray(x, dtype=np.float32)
    B, C, iH, iW = x.shape
    out = np.empty((B, C, oH, oW), dtype=np.float32)
    for i, (hlo, hhi) in enumerate(_adaptive_windows(iH, oH)):
        for j, (wlo, whi) in enumerate(_adaptive_windows(iW, oW)):
            out[:, :, i, j] = x[:, :, hlo:hhi, wlo:whi].mean(axis=(-2, -1))
    return out


if __name__ == "__main__":
    key = jax.random.PRNGKey(0)
    B, C, iH, iW = 2, 4, 16, 16
    output_size = (5, 3)  # non-divisible output to exercise adaptive windows

    x = jax.random.normal(key, (B, C, iH, iW), dtype=jnp.float32)

    out = adaptive_avg_pool2d(x, output_size)
    out = jax.block_until_ready(out)

    ref = _reference(np.asarray(x), output_size)
    assert out.shape == ref.shape, (out.shape, ref.shape)
    assert out.dtype == x.dtype, (out.dtype, x.dtype)
    assert np.allclose(np.asarray(out, dtype=np.float32), ref, rtol=1e-5, atol=1e-5)

    print("KERNEL_OK")
</pallas_src>

<mosaic_0001>
module attributes {stable_mosaic.version = 11 : i64} {
  func.func @_adaptive_avg_pool_kernel(%arg0: i32, %arg1: memref<8x16x16xf32, #tpu.memory_space<vmem>>, %arg2: memref<5x16xf32, #tpu.memory_space<vmem>>, %arg3: memref<16x3xf32, #tpu.memory_space<vmem>>, %arg4: memref<8x5x3xf32, #tpu.memory_space<vmem>>) attributes {dimension_semantics = [#tpu.dimension_semantics<parallel>], iteration_bounds = array<i64: 1>, scalar_prefetch = 0 : i64, scratch_operands = 0 : i64, tpu.core_type = #tpu.core_type<tc>, window_params = [{transform_indices = @transform_0, window_bounds = array<i64: 8, 16, 16>}, {pipeline_mode = #tpu.pipeline_mode<synchronous>, transform_indices = @transform_1, window_bounds = array<i64: 5, 16>}, {pipeline_mode = #tpu.pipeline_mode<synchronous>, transform_indices = @transform_2, window_bounds = array<i64: 16, 3>}, {transform_indices = @transform_3, window_bounds = array<i64: 8, 5, 3>}]} {
    %c0 = arith.constant 0 : index
    %c0_0 = arith.constant 0 : index
    %c0_1 = arith.constant 0 : index
    %0 = vector.load %arg1[%c0, %c0_0, %c0_1] : memref<8x16x16xf32, #tpu.memory_space<vmem>>, vector<8x16x16xf32>
    %c0_2 = arith.constant 0 : index
    %c0_3 = arith.constant 0 : index
    %1 = vector.load %arg2[%c0_2, %c0_3] : memref<5x16xf32, #tpu.memory_space<vmem>>, vector<5x16xf32>
    "tpu.trace_start"() <{level = 10 : i32, message = "oh,bhw->obw"}> : () -> ()
    %cst = arith.constant dense<0.000000e+00> : vector<5x8x16xf32>
    %2 = tpu.matmul %1, %0, %cst {dimension_numbers = #tpu.dot_dimension_numbers<[1], [1], [0], [0, 2], [0, 0, 1, 0, 1, 2], [], []>} : vector<5x16xf32>, vector<8x16x16xf32>, vector<5x8x16xf32> -> vector<5x8x16xf32>
    "tpu.trace_stop"() : () -> ()
    %c0_4 = arith.constant 0 : index
    %c0_5 = arith.constant 0 : index
    %3 = vector.load %arg3[%c0_4, %c0_5] : memref<16x3xf32, #tpu.memory_space<vmem>>, vector<16x3xf32>
    "tpu.trace_start"() <{level = 10 : i32, message = "obw,wq->boq"}> : () -> ()
    %cst_6 = arith.constant dense<0.000000e+00> : vector<3x5x8xf32>
    %4 = tpu.matmul %3, %2, %cst_6 {dimension_numbers = #tpu.dot_dimension_numbers<[0], [2], [1], [0, 1], [0, 1, 1, 0, 1, 1], [], []>} : vector<16x3xf32>, vector<5x8x16xf32>, vector<3x5x8xf32> -> vector<3x5x8xf32>
    %5 = tpu.transpose %4, [2, 1, 0] : vector<3x5x8xf32> -> vector<8x5x3xf32>
    "tpu.trace_stop"() : () -> ()
    %c0_7 = arith.constant 0 : index
    %c0_8 = arith.constant 0 : index
    %c0_9 = arith.constant 0 : index
    %6 = vector.load %arg4[%c0_7, %c0_8, %c0_9] : memref<8x5x3xf32, #tpu.memory_space<vmem>>, vector<8x5x3xf32>
    tpu.vector_store %arg4[%c0_7, %c0_8, %c0_9], %5 {strides = array<i32>} : memref<8x5x3xf32, #tpu.memory_space<vmem>>, vector<8x5x3xf32>,
    return
  }
  func.func @transform_0(%arg0: i32) -> (i32, i32, i32) {
    %c0_i32 = arith.constant 0 : i32
    %c0_i32_0 = arith.constant 0 : i32
    %c0_i32_1 = arith.constant 0 : i32
    return %arg0, %c0_i32, %c0_i32_0 : i32, i32, i32
  }
  func.func @transform_1(%arg0: i32) -> (i32, i32) {
    %c0_i32 = arith.constant 0 : i32
    %c0_i32_0 = arith.constant 0 : i32
    %c0_i32_1 = arith.constant 0 : i32
    return %c0_i32, %c0_i32_0 : i32, i32
  }
  func.func @transform_2(%arg0: i32) -> (i32, i32) {
    %c0_i32 = arith.constant 0 : i32
    %c0_i32_0 = arith.constant 0 : i32
    %c0_i32_1 = arith.constant 0 : i32
    return %c0_i32, %c0_i32_0 : i32, i32
  }
  func.func @transform_3(%arg0: i32) -> (i32, i32, i32) {
    %c0_i32 = arith.constant 0 : i32
    %c0_i32_0 = arith.constant 0 : i32
    %c0_i32_1 = arith.constant 0 : i32
    return %arg0, %c0_i32, %c0_i32_0 : i32, i32, i32
  }
}

</mosaic_0001>

<bundles_post_ra>
// kernel: tpu_custom_call.1
= control target key start
LH: loop header
LB: loop body
LE: loop exit
PB: predicated region body
PF: predicated region fallthrough
CT: control target
= control target key end

     0   :  { %8 = vsyncpa [#allocation3], 0  ;;  %s1761_s12 = smov [#allocation2]   ;;  %s2104_s0 = inlined_call_operand.hbm [shape: f32[8,16,16], index: 0, kind: input, shape index: {}]   ;;  %s2105_s1 = inlined_call_operand.vmem [shape: f32[5,16], index: 1, kind: input, shape index: {}]   ;;  %s2106_s2 = inlined_call_operand.vmem [shape: f32[16,3], index: 2, kind: input, shape index: {}]   ;;  %s2107_s3 = inlined_call_operand.vmem [shape: f32[8,5,3], index: 3, kind: output, shape index: {}]  }
   0x1   :  { %s14_s13 = sshll.u32 %s1761_s12, 4  ;;  %s15_s13 = int_to_ptr.vmem [resolvable:$true] %s14_s13 }
   0x2   :  { %s1747_s14 = scalar_lea.vmem %s15_s13, 2048  ;;  %p1752_p1 = scmp.lt.s32.totalorder %s15_s13, %s15_s13 }
   0x3   :  { %p1748_p0 = scmp.ne.s32.totalorder %s15_s13, %s1747_s14  ;;  %p1753_p2 = scmp.lt.s32.totalorder %s1747_s14, %s1747_s14 }
   0x5   :  { %p1754_p3 = por %p1753_p2, %p1752_p1 }
   0x7   :  { %p1755_p4 = pnand %p1754_p3, %p1748_p0 }
   0x9   :  { %1758 = shalt.err (!%p1755_p4)
}
   0xa   :  { %s1762_s15 = smov 128   ;;  %s1763_s16 = smov 8  }
   0xb   :  { %20 = dma.hbm_to_vmem [thread:$0]  %s2104_s0, 2048, %s15_s13, [#allocation3], %s1762_s15, %s1762_s15, %s1763_s16  }
   0xc   :  { %1759 = dma.done.wait [#allocation3], 2048  }
   0xd   :  { %1760 = vsyncadd [#allocation3], 4294965248  ;;  %v50_v0 = vlaneseq  ;;  %v1764_v1 = vmov 1983009808   ;;  %v1765_v3 = vmov 1934713408  }
   0xe   :  { %v48_v2 = vunpack.c.l.s4 %v1764_v1  ;;  %v112_v4 = vunpack.c.l.s4 %v1765_v3  ;;  %v29_v9 = vld [vmem:[#allocation2 + $0x8] sm:$0xff]  ;;  %v31_v10 = vld [vmem:[#allocation2 + $0x18] sm:$0xff]  ;;  %v28_v15 = vld [vmem:[#allocation2] sm:$0xff]  ;;  %s1766_s0 = smov 16   ;;  %s1767_s19 = smov 32   ;;  %vm1772_vm0 = vmmov 0  }
   0xf   :  { %v51_v5 = vshrl.u32 %v50_v0, 7  ;;  %v33_v11 = vld [vmem:[#allocation2 + $0x28] sm:$0xff]  ;;  %v35_v12 = vld [vmem:[#allocation2 + $0x38] sm:$0xff]  ;;  %v30_v16 = vld [vmem:[#allocation2 + $0x10] sm:$0xff]  ;;  %s1768_s20 = smov 48   ;;  %s1769_s21 = smov 64  }
  0x10   :  { %v49_v6 = vunpack.c.0.s8 %v48_v2  ;;  %v113_v7 = vunpack.c.0.s8 %v112_v4  ;;  %v181_v13 = vcombine.low %v29_v9, %v33_v11  ;;  %v182_v14 = vcombine.high %v29_v9, %v33_v11  ;;  %v32_v20 = vld [vmem:[#allocation2 + $0x20] sm:$0xff]  ;;  %v34_v21 = vld [vmem:[#allocation2 + $0x30] sm:$0xff]  ;;  %v1806_v22 = vld [vmem:[#allocation2 + $0x48] sm:$0xff]  ;;  %s1771_s22 = smov 80   ;;  %s1773_s23 = smov 96  }
  0x11   :  { %v197_v18 = vcombine.low %v31_v10, %v35_v12  ;;  %v198_v19 = vcombine.high %v31_v10, %v35_v12  ;;  %v45_v25 = vcombine.low %v28_v15, %v32_v20  ;;  %v46_v26 = vcombine.high %v28_v15, %v32_v20  ;;  %v1810_v27 = vld [vmem:[#allocation2 + $0x68] sm:$0xff]  ;;  %s1774_s24 = smov 112   ;;  %s1775_s30 = smov 24  }
  0x12   :  { %v1802_v8 = vsub.s32 %v49_v6, %v51_v5  ;;  %v1804_v17 = vsub.s32 %v113_v7, %v51_v5  ;;  %v61_v30 = vcombine.low %v30_v16, %v34_v21  ;;  %v62_v31 = vcombine.high %v30_v16, %v34_v21  ;;  %v39_v16 = vld [vmem:[#allocation2 + $0x58] sm:$0xff]  ;;  %s1777_s4 = smov 104  }
  0x13   :  { %v213_v34 = vcombine.low %v1806_v22, %v1810_v27  ;;  %v214_v41 = vcombine.high %v1806_v22, %v1810_v27  ;;  %v43_v22 = vld [vmem:[#allocation2 + $0x78] sm:$0xff]  ;;  %vm645_vm1 = vcmask 130048   ;;  %vm648_vm2 = vcmask 261120  }
  0x14   :  { %v189_v23 = vrot.slane %v181_v13, %v1802_v8  ;;  %v196_v24 = vrot.slane %v182_v14, %v1802_v8  ;;  %v205_v28 = vrot.slane %v197_v18, %v1802_v8  ;;  %v212_v29 = vrot.slane %v198_v19, %v1802_v8 }
  0x15   :  { %v53_v32 = vrot.slane %v45_v25, %v1802_v8  ;;  %v60_v33 = vrot.slane %v46_v26, %v1802_v8  ;;  %v69_v39 = vrot.slane %v61_v30, %v1802_v8  ;;  %v76_v40 = vrot.slane %v62_v31, %v1802_v8 }
  0x16   :  { %v245_v35 = vcombine.low %v189_v23, %v205_v28  ;;  %v246_v36 = vcombine.high %v189_v23, %v205_v28  ;;  %v261_v37 = vcombine.low %v196_v24, %v212_v29  ;;  %v262_v38 = vcombine.high %v196_v24, %v212_v29  ;;  %v36_v23 = vld [vmem:[#allocation2 + $0x40] sm:$0xff] }
  0x17   :  { %v1823_v42 = vrot.slane %v213_v34, %v1802_v8  ;;  %v109_v47 = vcombine.low %v53_v32, %v69_v39  ;;  %v110_v48 = vcombine.high %v53_v32, %v69_v39  ;;  %v125_v49 = vcombine.low %v60_v33, %v76_v40  ;;  %v40_v24 = vld [vmem:[#allocation2 + $0x60] sm:$0xff] }
  0x18   :  { %v253_v43 = vrot.slane %v245_v35, %v1804_v17  ;;  %v260_v44 = vrot.slane %v246_v36, %v1804_v17  ;;  %v269_v45 = vrot.slane %v261_v37, %v1804_v17  ;;  %v276_v46 = vrot.slane %v262_v38, %v1804_v17  ;;  %v38_v35 = vld [vmem:[#allocation2 + $0x50] sm:$0xff] }
  0x19   :  { %v126_v50 = vcombine.high %v60_v33, %v76_v40  ;;  %v117_v55 = vrot.slane %v109_v47, %v1804_v17  ;;  %v124_v56 = vrot.slane %v110_v48, %v1804_v17  ;;  %v133_v57 = vrot.slane %v125_v49, %v1804_v17  ;;  %v42_v36 = vld [vmem:[#allocation2 + $0x70] sm:$0xff] }
  0x1a   :  { %v1678_v51 = vcombine.low %v253_v43, %v260_v44  ;;  %v1680_v52 = vcombine.high %v253_v43, %v260_v44  ;;  %v1682_v53 = vcombine.low %v269_v45, %v276_v46  ;;  %v1684_v54 = vcombine.high %v269_v45, %v276_v46 }
  0x1b   :  { %v140_v58 = vrot.slane %v126_v50, %v1804_v17  ;;  %v1670_v63 = vcombine.low %v117_v55, %v124_v56  ;;  %v1672_v0 = vcombine.high %v117_v55, %v124_v56  ;;  %v228_v28 = vrot.slane %v214_v41, %v1802_v8 }
  0x1c   :  { %v461_v59 = vrot.slane %v1678_v51, %v1802_v8  ;;  %v477_v60 = vrot.slane %v1680_v52, %v1802_v8  ;;  %v493_v61 = vrot.slane %v1682_v53, %v1802_v8  ;;  %v509_v62 = vrot.slane %v1684_v54, %v1802_v8 }
  0x1d   :  { %v1674_v1 = vcombine.low %v133_v57, %v140_v58  ;;  %v1676_v2 = vcombine.high %v133_v57, %v140_v58  ;;  %v325_v7 = vrot.slane %v1670_v63, %v1802_v8  ;;  %v341_v9 = vrot.slane %v1672_v0, %v1802_v8 }
  0x1e   :  { %v517_v3 = vcombine.low %v461_v59, %v477_v60  ;;  %v549_v4 = vcombine.low %v493_v61, %v509_v62  ;;  %v518_v5 = vcombine.high %v461_v59, %v477_v60  ;;  %v550_v6 = vcombine.high %v493_v61, %v509_v62 }
  0x1f   :  { %v357_v10 = vrot.slane %v1674_v1, %v1802_v8  ;;  %v373_v11 = vrot.slane %v1676_v2, %v1802_v8  ;;  %v381_v18 = vcombine.low %v325_v7, %v341_v9  ;;  %v382_v20 = vcombine.high %v325_v7, %v341_v9 }
  0x20   :  { %v1842_v12 = vrot.slane %v517_v3, %v1804_v17  ;;  %v1845_v13 = vrot.slane %v549_v4, %v1804_v17  ;;  %v532_v14 = vrot.slane %v518_v5, %v1804_v17  ;;  %v564_v15 = vrot.slane %v550_v6, %v1804_v17 }
  0x21   :  { %v413_v19 = vcombine.low %v357_v10, %v373_v11  ;;  %v414_v21 = vcombine.high %v357_v10, %v373_v11  ;;  %v1855_v29 = vrot.slane %v381_v18, %v1804_v17  ;;  %v396_v31 = vrot.slane %v382_v20, %v1804_v17 }
  0x22   :  { %v582_v25 = vcombine.high %v1842_v12, %v1845_v13  ;;  %v581_v26 = vcombine.low %v1842_v12, %v1845_v13  ;;  %v583_v27 = vcombine.low %v532_v14, %v564_v15  ;;  %v229_v33 = vcombine.low %v39_v16, %v43_v22 }
  0x23   :  { %v1858_v30 = vrot.slane %v413_v19, %v1804_v17  ;;  %v428_v32 = vrot.slane %v414_v21, %v1804_v17  ;;  %v230_v34 = vcombine.high %v39_v16, %v43_v22  ;;  %v77_v37 = vcombine.low %v36_v23, %v40_v24 }
  0x24   :  { %593 = vrot.lane.b32.xlu0 %v582_v25, %s1766_s0  ;;  %v78_v38 = vcombine.high %v36_v23, %v40_v24  ;;  %v584_v41 = vcombine.high %v532_v14, %v564_v15  ;;  %v237_v44 = vrot.slane %v229_v33, %v1802_v8  ;;  %v93_v48 = vcombine.low %v38_v35, %v42_v36 }
  0x25   :  { %v446_v39 = vcombine.high %v1855_v29, %v1858_v30  ;;  %v445_v40 = vcombine.low %v1855_v29, %v1858_v30  ;;  %v447_v43 = vcombine.low %v396_v31, %v428_v32  ;;  %v244_v45 = vrot.slane %v230_v34, %v1802_v8 }
  0x26   :  { %v85_v46 = vrot.slane %v77_v37, %v1802_v8  ;;  %v92_v47 = vrot.slane %v78_v38, %v1802_v8  ;;  %v94_v49 = vcombine.high %v38_v35, %v42_v36  ;;  %v277_v50 = vcombine.low %v1823_v42, %v237_v44 }
  0x27   :  { %591 = vrot.lane.b32.xlu1 %v446_v39, %s1766_s0  ;;  %v278_v51 = vcombine.high %v1823_v42, %v237_v44  ;;  %v293_v52 = vcombine.low %v228_v28, %v244_v45  ;;  %v294_v53 = vcombine.high %v228_v28, %v244_v45  ;;  %v448_v54 = vcombine.high %v396_v31, %v428_v32 }
  0x28   :  { %601 = vrot.lane.b32.xlu0 %v583_v27, %s1767_s19  ;;  %v101_v55 = vrot.slane %v93_v48, %v1802_v8  ;;  %v108_v56 = vrot.slane %v94_v49, %v1802_v8  ;;  %v285_v57 = vrot.slane %v277_v50, %v1804_v17  ;;  %vm651_vm3 = vcmask 392192  }
  0x29   :  { %v292_v58 = vrot.slane %v278_v51, %v1804_v17  ;;  %v301_v59 = vrot.slane %v293_v52, %v1804_v17  ;;  %v308_v60 = vrot.slane %v294_v53, %v1804_v17  ;;  %vm654_vm4 = vcmask 523264  }
  0x2a   :  { %v141_v61 = vcombine.low %v85_v46, %v101_v55  ;;  %v142_v42 = vcombine.high %v85_v46, %v101_v55  ;;  %v157_v62 = vcombine.low %v92_v47, %v108_v56  ;;  %v158_v63 = vcombine.high %v92_v47, %v108_v56 }
  0x2b   :  { %609 = vrot.lane.b32.xlu1 %v584_v41, %s1768_s20  ;;  %v1679_v0 = vcombine.low %v285_v57, %v292_v58  ;;  %v1681_v1 = vcombine.high %v285_v57, %v292_v58  ;;  %v1683_v2 = vcombine.low %v301_v59, %v308_v60  ;;  %v1685_v3 = vcombine.high %v301_v59, %v308_v60 }
  0x2c   :  { %599 = vrot.lane.b32.xlu0 %v447_v43, %s1767_s19  ;;  %v149_v4 = vrot.slane %v141_v61, %v1804_v17  ;;  %v156_v5 = vrot.slane %v142_v42, %v1804_v17  ;;  %v165_v6 = vrot.slane %v157_v62, %v1804_v17  ;;  %v172_v7 = vrot.slane %v158_v63, %v1804_v17 }
  0x2d   :  { %v468_v9 = vrot.slane %v1679_v0, %v1802_v8  ;;  %v484_v10 = vrot.slane %v1681_v1, %v1802_v8  ;;  %v500_v11 = vrot.slane %v1683_v2, %v1802_v8  ;;  %v516_v14 = vrot.slane %v1685_v3, %v1802_v8 }
  0x2e   :  { %v1671_v15 = vcombine.low %v149_v4, %v156_v5  ;;  %v1673_v16 = vcombine.high %v149_v4, %v156_v5  ;;  %v1675_v18 = vcombine.low %v165_v6, %v172_v7  ;;  %v1677_v19 = vcombine.high %v165_v6, %v172_v7 }
  0x2f   :  { %v533_v20 = vcombine.low %v468_v9, %v484_v10  ;;  %v565_v21 = vcombine.low %v500_v11, %v516_v14  ;;  %v534_v31 = vcombine.high %v468_v9, %v484_v10  ;;  %v566_v32 = vcombine.high %v500_v11, %v516_v14 }
  0x30   :  { %607 = vrot.lane.b32.xlu0 %v448_v54, %s1768_s20  ;;  %v332_v22 = vrot.slane %v1671_v15, %v1802_v8  ;;  %v348_v23 = vrot.slane %v1673_v16, %v1802_v8  ;;  %v364_v24 = vrot.slane %v1675_v18, %v1802_v8  ;;  %v380_v25 = vrot.slane %v1677_v19, %v1802_v8 }
  0x31   :  { %v541_v27 = vrot.slane %v533_v20, %v1804_v17  ;;  %v573_v28 = vrot.slane %v565_v21, %v1804_v17  ;;  %v548_v43 = vrot.slane %v534_v31, %v1804_v17  ;;  %v580_v44 = vrot.slane %v566_v32, %v1804_v17 }
  0x32   :  { %v397_v33 = vcombine.low %v332_v22, %v348_v23  ;;  %v429_v34 = vcombine.low %v364_v24, %v380_v25  ;;  %v398_v38 = vcombine.high %v332_v22, %v348_v23  ;;  %v430_v39 = vcombine.high %v364_v24, %v380_v25 }
  0x33   :  { %v585_v35 = vcombine.low %v541_v27, %v573_v28  ;;  %v586_v41 = vcombine.high %v541_v27, %v573_v28  ;;  %v1770_v46 = vmov 0.0   ;;  %v587_v50 = vcombine.low %v548_v43, %v580_v44 }
  0x34   :  { %v405_v36 = vrot.slane %v397_v33, %v1804_v17  ;;  %v437_v37 = vrot.slane %v429_v34, %v1804_v17  ;;  %1702 = vmatprep.subr.mxu0 %v1770_v46  ;;  %1709 = vmatprep.subr.mxu1 %v1770_v46  ;;  %v412_v48 = vrot.slane %v398_v38, %v1804_v17  ;;  %vm657_vm5 = vcmask 654336  }
  0x35   :  { %617 = vrot.lane.b32.xlu1 %v585_v35, %s1769_s21  ;;  %v444_v49 = vrot.slane %v430_v39, %v1804_v17  ;;  %1706 = vmatprep.mubr.msk.f32.mxu0 %vm1772_vm0, %v1770_v46  ;;  %v666_v51 = vcombine.low %v1770_v46, %v1770_v46  ;;  %v1914_v52 = vcombine.high %v1770_v46, %v1770_v46  ;;  %vm660_vm6 = vcmask 785408  }
  0x36   :  { %v449_v45 = vcombine.low %v405_v36, %v437_v37  ;;  %v450_v47 = vcombine.high %v405_v36, %v437_v37  ;;  %1719 = vmatprep.mubr.msk.f32.mxu1 %vm1772_vm0, %v1770_v46  ;;  %v588_v56 = vcombine.high %v548_v43, %v580_v44  ;;  %vm663_vm7 = vcmask 916480   ;;  %v44_v44 = vld [vmem:[%s2105_s1] sm:$0x1f] }
  0x37   :  { %v451_v53 = vcombine.low %v412_v48, %v444_v49  ;;  %v1919_v54 = vrot.slane %v666_v51, %v1802_v8  ;;  %v1923_v55 = vrot.slane %v1914_v52, %v1802_v8  ;;  %v733_v61 = vrot.slane %v1914_v52, %v1804_v17 }
  0x38   :  { %615 = vrot.lane.b32.xlu0 %v449_v45, %s1769_s21  ;;  %v452_v62 = vcombine.high %v412_v48, %v444_v49  ;;  %vm1048_vm8 = vcmask 64512   ;;  %vm1051_vm9 = vcmask 195584   ;;  %vm1656_vm10 = vcmask 20480  }
  0x39   :  { %625 = vrot.lane.b32.xlu1 %v586_v41, %s1771_s22  ;;  %v688_v57 = vcombine.low %v1919_v54, %v1919_v54  ;;  %v689_v58 = vcombine.high %v1919_v54, %v1919_v54  ;;  %v704_v42 = vcombine.low %v1923_v55, %v1923_v55  ;;  %v741_v0 = vrot.slane %v1923_v55, %v1804_v17 }
  0x3a   :  { %v705_v3 = vcombine.high %v1923_v55, %v1923_v55  ;;  %v734_v4 = vcombine.high %v1923_v55, %v1770_v46 }
  0x3b   :  { %v1932_v59 = vrot.slane %v688_v57, %v1804_v17  ;;  %v703_v60 = vrot.slane %v689_v58, %v1804_v17  ;;  %v712_v2 = vrot.slane %v704_v42, %v1804_v17 }
  0x3c   :  { %623 = vrot.lane.b32.xlu0 %v450_v47, %s1771_s22  ;;  %v719_v7 = vrot.slane %v705_v3, %v1804_v17  ;;  %v748_v9 = vrot.slane %v734_v4, %v1804_v17  ;;  %v1007_v4 = vcombine.high %v1919_v54, %v1770_v46 }
  0x3d   :  { %633 = vrot.lane.b32.xlu1 %v587_v50, %s1773_s23  ;;  %v750_v63 = vcombine.high %v1932_v59, %v1770_v46  ;;  %v752_v1 = vcombine.high %v703_v60, %v733_v61  ;;  %v751_v5 = vcombine.low %v703_v60, %v733_v61  ;;  %v754_v6 = vcombine.high %v712_v2, %v741_v0 }
  0x3e   :  { %v753_v10 = vcombine.low %v712_v2, %v741_v0  ;;  %v756_v11 = vcombine.high %v719_v7, %v748_v9  ;;  %v755_v14 = vcombine.low %v719_v7, %v748_v9  ;;  %v749_v39 = vcombine.low %v1932_v59, %v1770_v46 }
  0x3f   :  { %v1006_v2 = vcombine.low %v1919_v54, %v1770_v46  ;;  %v1021_v7 = vrot.slane %v1007_v4, %v1804_v17  ;;  %v1022_v54 = vcombine.low %v1923_v55, %v1914_v52 }
  0x40   :  { %631 = vrot.lane.b32.xlu0 %v451_v53, %s1773_s23 }
  0x41   :  { %641 = vrot.lane.b32.xlu1 %v588_v56, %s1774_s24  ;;  %v2006_v3 = vrot.slane %v1006_v2, %v1804_v17  ;;  %v1024_v9 = vcombine.high %v1021_v7, %v1770_v46 }
  0x44   :  { %758 = vrot.lane.b32.xlu0 %v750_v63, %s1766_s0 }
  0x45   :  { %639 = vrot.lane.b32.xlu1 %v452_v62, %s1774_s24 }
  0x48   :  { %766 = vrot.lane.b32.xlu0 %v752_v1, %s1768_s20  ;;  %v1004_v1 = vld [vmem:[%s2106_s2] sm:$0xff] }
  0x49   :  { %762 = vrot.lane.b32.xlu1 %v751_v5, %s1767_s19  ;;  %v1005_v5 = vld [vmem:[%s2106_s2 + $0x8] sm:$0xff]  ;;  %s1776_s2 = smov 120  }
  0x4c   :  { %774 = vrot.lane.b32.xlu0 %v754_v6, %s1771_s22  ;;  %v1023_v6 = vcombine.high %v2006_v3, %v1770_v46 }
  0x4d   :  { %770 = vrot.lane.b32.xlu1 %v753_v10, %s1769_s21  ;;  %v1031_v10 = vrot.slane %v1022_v54, %v1804_v17 }
  0x50   :  { %782 = vrot.lane.b32.xlu0 %v756_v11, %s1774_s24 }
  0x51   :  { %778 = vrot.lane.b32.xlu1 %v755_v14, %s1773_s23 }
  0x96   :  { %v594_v15 = vpop.permute.xlu0 %593 }
  0x97   :  { %v647_v25 = vsel %vm645_vm1, %v581_v26, %v594_v15 }
  0x99   :  { %v592_v18 = vpop.permute.xlu1 %591 }
  0x9a   :  { %v602_v16 = vpop.permute.xlu0 %601  ;;  %v646_v32 = vsel %vm645_vm1, %v445_v40, %v592_v18 }
  0x9b   :  { %v650_v27 = vsel %vm648_vm2, %v647_v25, %v602_v16 }
  0x9d   :  { %v610_v20 = vpop.permute.xlu1 %609 }
  0x9e   :  { %v600_v19 = vpop.permute.xlu0 %599  ;;  %v653_v33 = vsel %vm651_vm3, %v650_v27, %v610_v20 }
  0x9f   :  { %v649_v34 = vsel %vm648_vm2, %v646_v32, %v600_v19 }
  0xa2   :  { %v608_v21 = vpop.permute.xlu0 %607 }
  0xa3   :  { %v652_v13 = vsel %vm651_vm3, %v649_v34, %v608_v21 }
  0xa7   :  { %v618_v22 = vpop.permute.xlu1 %617 }
  0xa8   :  { %v656_v12 = vsel %vm654_vm4, %v653_v33, %v618_v22 }
  0xaa   :  { %v616_v23 = vpop.permute.xlu0 %615 }
  0xab   :  { %v626_v24 = vpop.permute.xlu1 %625  ;;  %v655_v36 = vsel %vm654_vm4, %v652_v13, %v616_v23 }
  0xac   :  { %v659_v26 = vsel %vm657_vm5, %v656_v12, %v626_v24 }
  0xae   :  { %v624_v28 = vpop.permute.xlu0 %623 }
  0xaf   :  { %v634_v31 = vpop.permute.xlu1 %633  ;;  %v658_v30 = vsel %vm657_vm5, %v655_v36, %v624_v28 }
  0xb0   :  { %v662_v37 = vsel %vm660_vm6, %v659_v26, %v634_v31 }
  0xb2   :  { %v632_v35 = vpop.permute.xlu0 %631 }
  0xb3   :  { %v642_v29 = vpop.permute.xlu1 %641  ;;  %v661_v38 = vsel %vm660_vm6, %v658_v30, %v632_v35 }
  0xb4   :  { %v665_v40 = vsel %vm663_vm7, %v662_v37, %v642_v29 }
  0xb5   :  { %1703 = vmatpush3.msra.mxu0 %v665_v40 }
  0xb6   :  { %1704 = vmatprep.subr.mxu0 %v1770_v46  ;;  %v759_v41 = vpop.permute.xlu0 %758 }
  0xb7   :  { %v640_v43 = vpop.permute.xlu1 %639  ;;  %v785_v47 = vsel %vm645_vm1, %v749_v39, %v759_v41 }
  0xb8   :  { %v664_v45 = vsel %vm663_vm7, %v661_v38, %v640_v43 }
  0xb9   :  { %1705 = vmatpush3.msra.mxu0 %v664_v45 }
  0xba   :  { %1707 = vmatmul.mubr.msk.f32.vlgmr.msra.gmra.mxu0 %vm645_vm1, %v44_v44  ;;  %v767_v48 = vpop.permute.xlu0 %766 }
  0xbb   :  { %v763_v49 = vpop.permute.xlu1 %762 }
  0xbc   :  { %v786_v50 = vsel %vm648_vm2, %v785_v47, %v763_v49 }
  0xbd   :  { %v787_v51 = vsel %vm651_vm3, %v786_v50, %v767_v48 }
  0xbe   :  { %v775_v53 = vpop.permute.xlu0 %774 }
  0xbf   :  { %v771_v56 = vpop.permute.xlu1 %770 }
  0xc0   :  { %v788_v57 = vsel %vm654_vm4, %v787_v51, %v771_v56 }
  0xc1   :  { %v789_v58 = vsel %vm657_vm5, %v788_v57, %v775_v53 }
  0xc2   :  { %v783_v59 = vpop.permute.xlu0 %782 }
  0xc3   :  { %v779_v60 = vpop.permute.xlu1 %778 }
  0xc4   :  { %v790_v61 = vsel %vm660_vm6, %v789_v58, %v779_v60 }
  0xc5   :  { %v791_v42 = vsel %vm663_vm7, %v790_v61, %v783_v59 }
 0x17a   :  { %v861_v62 = vpop.f32.mrf.mxu0 }
 0x17b   :  { %v862_v63 = vadd.f32 %v861_v62, %v791_v42 }
 0x17c   :  { %v1708_v0 = vpop.f32.mrf.mxu0 }
 0x17d   :  { %869 = vrot.lane.b32.xlu0 %v862_v63, %s1773_s23  ;;  %866 = vrot.lane.b32.xlu1 %v862_v63, %s1774_s24 }
 0x181   :  { %875 = vrot.lane.b32.xlu0 %v862_v63, %s1769_s21  ;;  %872 = vrot.lane.b32.xlu1 %v862_v63, %s1771_s22 }
 0x185   :  { %881 = vrot.lane.b32.xlu0 %v862_v63, %s1767_s19  ;;  %878 = vrot.lane.b32.xlu1 %v862_v63, %s1768_s20 }
 0x189   :  { %884 = vrot.lane.b32.xlu1 %v862_v63, %s1766_s0 }
 0x18d   :  { %1033 = vrot.lane.b32.xlu1 %v1023_v6, %s1763_s16 }
 0x191   :  { %1037 = vrot.lane.b32.xlu1 %v1021_v7, %s1766_s0 }
 0x195   :  { %1041 = vrot.lane.b32.xlu1 %v1024_v9, %s1775_s30 }
 0x199   :  { %1045 = vrot.lane.b32.xlu1 %v1031_v10, %s1767_s19 }
 0x1a3   :  { %1054 = vxpose.xlu0.b32.start [1/2] (short) (narrow) %v1004_v1, 8 }
 0x1a7   :  { %1055 = vxpose.xlu0.b32.end [2/2] (short) (narrow) %v1005_v5, 8 }
 0x1ef   :  { %v870_v11 = vpop.permute.xlu0 %869  ;;  %v867_v14 = vpop.permute.xlu1 %866 }
 0x1f0   :  { %v888_v19 = vcombine.high %v862_v63, %v870_v11  ;;  %v887_v27 = vcombine.low %v862_v63, %v870_v11 }
 0x1f2   :  { %v902_v52 = vrot.slane %v888_v19, %v1802_v8  ;;  %v895_v35 = vrot.slane %v887_v27, %v1802_v8 }
 0x1f3   :  { %v876_v15 = vpop.permute.xlu0 %875  ;;  %v873_v16 = vpop.permute.xlu1 %872 }
 0x1f4   :  { %v904_v18 = vcombine.high %v867_v14, %v873_v16  ;;  %v903_v22 = vcombine.low %v867_v14, %v873_v16 }
 0x1f6   :  { %v918_v23 = vrot.slane %v904_v18, %v1802_v8  ;;  %v911_v32 = vrot.slane %v903_v22, %v1802_v8 }
 0x1f7   :  { %v882_v20 = vpop.permute.xlu0 %881  ;;  %v879_v21 = vpop.permute.xlu1 %878 }
 0x1f8   :  { %v919_v24 = vcombine.low %v876_v15, %v882_v20  ;;  %v920_v25 = vcombine.high %v876_v15, %v882_v20  ;;  %v967_v33 = vcombine.low %v902_v52, %v918_v23  ;;  %v952_v29 = vcombine.high %v895_v35, %v911_v32 }
 0x1f9   :  { %v951_v45 = vcombine.low %v895_v35, %v911_v32 }
 0x1fa   :  { %v927_v34 = vrot.slane %v919_v24, %v1802_v8  ;;  %v934_v12 = vrot.slane %v920_v25, %v1802_v8  ;;  %v974_v30 = vrot.slane %v967_v33, %v1804_v17  ;;  %v966_v41 = vrot.slane %v952_v29, %v1804_v17 }
 0x1fb   :  { %v885_v55 = vpop.permute.xlu1 %884  ;;  %v959_v49 = vrot.slane %v951_v45, %v1804_v17 }
 0x1fc   :  { %v935_v28 = vcombine.low %v879_v21, %v885_v55  ;;  %v936_v31 = vcombine.high %v879_v21, %v885_v55 }
 0x1fe   :  { %v943_v13 = vrot.slane %v935_v28, %v1802_v8  ;;  %v950_v26 = vrot.slane %v936_v31, %v1802_v8 }
 0x1ff   :  { %v1034_v56 = vpop.permute.xlu1 %1033 }
 0x200   :  { %v976_v36 = vcombine.high %v927_v34, %v943_v13  ;;  %v991_v37 = vcombine.low %v934_v12, %v950_v26  ;;  %v975_v43 = vcombine.low %v927_v34, %v943_v13  ;;  %v1049_v58 = vsel %vm1048_vm8, %v2006_v3, %v1034_v56 }
 0x202   :  { %v998_v40 = vrot.slane %v991_v37, %v1804_v17  ;;  %v990_v38 = vrot.slane %v976_v36, %v1804_v17  ;;  %v983_v47 = vrot.slane %v975_v43, %v1804_v17 }
 0x203   :  { %v1038_v57 = vpop.permute.xlu1 %1037 }
 0x204   :  { %v1003_v39 = vcombine.low %v974_v30, %v998_v40  ;;  %v1002_v44 = vcombine.high %v966_v41, %v990_v38  ;;  %v1001_v48 = vcombine.low %v966_v41, %v990_v38  ;;  %v1000_v50 = vcombine.high %v959_v49, %v983_v47 }
 0x205   :  { %v999_v51 = vcombine.low %v959_v49, %v983_v47  ;;  %v1050_v60 = vsel %vm645_vm1, %v1049_v58, %v1038_v57 }
 0x206   :  { %1710 = vmatpush3.xpose.msk.msra.mxu1 %vm645_vm1, %v1003_v39 }
 0x207   :  { %1711 = vmatprep.subr.mxu1 %v1770_v46  ;;  %v1042_v59 = vpop.permute.xlu1 %1041 }
 0x208   :  { %v1052_v61 = vsel %vm1051_vm9, %v1050_v60, %v1042_v59 }
 0x20a   :  { %1712 = vmatpush3.xpose.msk.msra.mxu1 %vm645_vm1, %v1002_v44 }
 0x20b   :  { %1713 = vmatprep.subr.mxu1 %v1770_v46  ;;  %v1046_v42 = vpop.permute.xlu1 %1045 }
 0x20c   :  { %v1053_v62 = vsel %vm648_vm2, %v1052_v61, %v1046_v42 }
 0x20e   :  { %1714 = vmatpush3.xpose.msk.msra.mxu1 %vm645_vm1, %v1001_v48 }
 0x20f   :  { %1715 = vmatprep.subr.mxu1 %v1770_v46 }
 0x212   :  { %1716 = vmatpush3.xpose.msk.msra.mxu1 %vm645_vm1, %v1000_v50 }
 0x213   :  { %1717 = vmatprep.subr.mxu1 %v1770_v46 }
 0x216   :  { %1718 = vmatpush3.xpose.msk.msra.mxu1 %vm645_vm1, %v999_v51 }
 0x21f   :  { %v1070_v53 = vpop.trf.xlu0 }
 0x220   :  { %1720 = vmatmul.mubr.msk.f32.vlgmr.msra.gmra.mxu1 %vm645_vm1, %v1070_v53 }
 0x2e0   :  { %v1170_v63 = vpop.f32.mrf.mxu1 }
 0x2e1   :  { %v1171_v0 = vadd.f32 %v1170_v63, %v1053_v62 }
 0x2e2   :  { %v1721_v1 = vpop.f32.mrf.mxu1 }
 0x2e3   :  { %1175 = vrot.lane.b32.xlu1 %v1171_v0, %s1776_s2 }
 0x2e7   :  { %1178 = vrot.lane.b32.xlu1 %v1171_v0, %s1774_s24 }
 0x2eb   :  { %1181 = vrot.lane.b32.xlu1 %v1171_v0, %s1777_s4 }
 0x2ef   :  { %1184 = vrot.lane.b32.xlu1 %v1171_v0, %s1773_s23 }
 0x355   :  { %v1176_v2 = vpop.permute.xlu1 %1175 }
 0x359   :  { %v1179_v3 = vpop.permute.xlu1 %1178 }
 0x35a   :  { %v1186_v4 = vcombine.low %v1171_v0, %v1179_v3 }
 0x35c   :  { %v1193_v7 = vrot.slane %v1186_v4, %v1802_v8 }
 0x35d   :  { %v1182_v5 = vpop.permute.xlu1 %1181 }
 0x35e   :  { %v1194_v6 = vcombine.low %v1176_v2, %v1182_v5 }
 0x360   :  { %v1201_v9 = vrot.slane %v1194_v6, %v1802_v8 }
 0x361   :  { %v1185_v54 = vpop.permute.xlu1 %1184 }
 0x362   :  { %v1210_v10 = vcombine.low %v1193_v7, %v1201_v9  ;;  %v1211_v11 = vcombine.high %v1193_v7, %v1201_v9  ;;  %v1209_v14 = vrot.slane %v1185_v54, %v1802_v8 }
 0x364   :  { %v1232_v15 = vrot.slane %v1209_v14, %v1804_v17  ;;  %v1218_v16 = vrot.slane %v1210_v10, %v1804_v17  ;;  %v1233_v18 = vcombine.high %v1209_v14, %v1770_v46  ;;  %v1225_v21 = vrot.slane %v1211_v11, %v1804_v17 }
 0x366   :  { %v1235_v19 = vcombine.high %v1218_v16, %v1232_v15  ;;  %v1234_v20 = vcombine.low %v1218_v16, %v1232_v15  ;;  %v1236_v22 = vcombine.low %v1225_v21, %v1233_v18 }
 0x368   :  { %1269 = vxpose.xlu0.b32.start.end [1/1] (short) (narrow) %v1235_v19, 8  ;;  %1237 = vxpose.xlu1.b32.start.end [1/1] (short) (narrow) %v1234_v20, 8 }
 0x36c   :  { %1301 = vxpose.xlu0.b32.start.end [1/1] (short) (narrow) %v1236_v22, 8 }
 0x3e4   :  { %v1285_v23 = vpop.trf.xlu0  ;;  %v1253_v24 = vpop.trf.xlu1 }
 0x3e5   :  { %v1356_v55 = vrot.slane %v1285_v23, %v1802_v8  ;;  %v1349_v31 = vcombine.high %v1285_v23, %v1770_v46 }
 0x3e7   :  { %v1363_v13 = vrot.slane %v1349_v31, %v1802_v8 }
 0x3e8   :  { %v1317_v25 = vpop.trf.xlu0 }
 0x3e9   :  { %v1333_v52 = vcombine.low %v1253_v24, %v1317_v25  ;;  %v1334_v27 = vcombine.high %v1253_v24, %v1317_v25 }
 0x3eb   :  { %v1341_v28 = vrot.slane %v1333_v52, %v1802_v8  ;;  %v1348_v33 = vrot.slane %v1334_v27, %v1802_v8 }
 0x3ed   :  { %v1364_v32 = vcombine.low %v1341_v28, %v1356_v55  ;;  %v1365_v12 = vcombine.high %v1341_v28, %v1356_v55  ;;  %v1380_v35 = vcombine.low %v1348_v33, %v1363_v13  ;;  %v1381_v37 = vcombine.high %v1348_v33, %v1363_v13 }
 0x3ef   :  { %v1372_v34 = vrot.slane %v1364_v32, %v1804_v17  ;;  %v1379_v26 = vrot.slane %v1365_v12, %v1804_v17  ;;  %v1388_v36 = vrot.slane %v1380_v35, %v1804_v17  ;;  %v1395_v29 = vrot.slane %v1381_v37, %v1804_v17 }
 0x3f1   :  { %1400 = vxpose.xlu0.b32.start.end [1/1] (short) (narrow) %v1372_v34, 8  ;;  %v1396_v30 = vcombine.high %v1372_v34, %v1770_v46  ;;  %v1397_v40 = vcombine.high %v1379_v26, %v1770_v46  ;;  %v1398_v8 = vcombine.high %v1388_v36, %v1770_v46  ;;  %v1399_v38 = vcombine.high %v1395_v29, %v1770_v46 }
 0x3f5   :  { %1464 = vxpose.xlu0.b32.start.end [1/1] (short) (narrow) %v1379_v26, 8 }
 0x3f9   :  { %1528 = vxpose.xlu0.b32.start.end [1/1] (short) (narrow) %v1388_v36, 8 }
 0x3fd   :  { %1592 = vxpose.xlu0.b32.start.end [1/1] (short) (narrow) %v1395_v29, 8 }
 0x401   :  { %1432 = vxpose.xlu0.b32.start.end [1/1] (short) (narrow) %v1396_v30, 8 }
 0x405   :  { %1496 = vxpose.xlu0.b32.start.end [1/1] (short) (narrow) %v1397_v40, 8 }
 0x409   :  { %1560 = vxpose.xlu0.b32.start.end [1/1] (short) (narrow) %v1398_v8, 8 }
 0x40d   :  { %1624 = vxpose.xlu0.b32.start.end [1/1] (short) (narrow) %v1399_v38, 8 }
 0x46d   :  { %v1416_v39 = vpop.trf.xlu0 }
 0x46e   :  { %1657 = vst.msk [vmem:[%s2107_s3] sm:$0x1f] %vm1656_vm10, %v1416_v39 }
 0x471   :  { %v1480_v17 = vpop.trf.xlu0 }
 0x472   :  { %1659 = vst.msk [vmem:[%s2107_s3 + $0x10] sm:$0x1f] %vm1656_vm10, %v1480_v17 }
 0x475   :  { %v1544_v41 = vpop.trf.xlu0 }
 0x476   :  { %1661 = vst.msk [vmem:[%s2107_s3 + $0x20] sm:$0x1f] %vm1656_vm10, %v1544_v41 }
 0x479   :  { %v1608_v46 = vpop.trf.xlu0 }
 0x47a   :  { %1663 = vst.msk [vmem:[%s2107_s3 + $0x30] sm:$0x1f] %vm1656_vm10, %v1608_v46 }
 0x47d   :  { %v1448_v43 = vpop.trf.xlu0 }
 0x47e   :  { %1658 = vst.msk [vmem:[%s2107_s3 + $0x8] sm:$0x1f] %vm1656_vm10, %v1448_v43 }
 0x481   :  { %v1512_v44 = vpop.trf.xlu0 }
 0x482   :  { %1660 = vst.msk [vmem:[%s2107_s3 + $0x18] sm:$0x1f] %vm1656_vm10, %v1512_v44 }
 0x485   :  { %v1576_v45 = vpop.trf.xlu0 }
 0x486   :  { %1662 = vst.msk [vmem:[%s2107_s3 + $0x28] sm:$0x1f] %vm1656_vm10, %v1576_v45 }
 0x489   :  { %v1640_v47 = vpop.trf.xlu0 }
 0x48a   :  { %1664 = vst.msk [vmem:[%s2107_s3 + $0x38] sm:$0x1f] %vm1656_vm10, %v1640_v47 }
 0x48b   :  { %1669 = vsyncpa [#allocation3], 1 }

</bundles_post_ra>
